<compile_context>
chip_gen: v7x
topology: tpu7x:2x2x1
jax: 0.10.0
libtpu: 0.0.40
codegen_flags: <defaults>
</compile_context>

<pallas_src>
import jax
import jax.numpy as jnp
from jax.experimental import pallas as pl
from jax.experimental.pallas import tpu as pltpu

_MIB = 1024 * 1024


def _round_up(n, m):
    return ((n + m - 1) // m) * m


def _vmem_capacity_bytes():
    try:
        info = pltpu.get_tpu_info()
        cap = int(getattr(info, "vmem_capacity_bytes", 0) or 0)
        if cap > 0:
            return cap
    except Exception:
        pass
    return 64 * _MIB  # conservative default (v7x-sized VMEM)


# ---------------------------------------------------------------------------
# Kernels
# ---------------------------------------------------------------------------
def _ffn_kernel_resident(x_ref, w1_ref, b1_ref, w2_ref, b2_ref, o_ref):
    # x_ref:  (tm, Hp)     token tile
    # w1_ref: (F4p, Hp)    full W1, torch [out, in] layout (resident across grid)
    # b1_ref: (1, F4p)     f32
    # w2_ref: (Hp, F4p)    full W2, torch [out, in] layout (resident across grid)
    # b2_ref: (1, Hp)      f32
    h = jax.lax.dot_general(
        x_ref[...], w1_ref[...],
        dimension_numbers=(((1,), (1,)), ((), ())),
        preferred_element_type=jnp.float32,
    )
    h = jnp.maximum(h + b1_ref[...], 0.0)          # bias + ReLU in f32 (v5e VPU has no bf16)
    # dropout == identity in eval mode.
    out = jax.lax.dot_general(
        h.astype(w2_ref.dtype), w2_ref[...],
        dimension_numbers=(((1,), (1,)), ((), ())),
        preferred_element_type=jnp.float32,
    )
    o_ref[...] = (out + b2_ref[...]).astype(o_ref.dtype)


def _ffn_kernel_chunked(x_ref, w1_ref, b1_ref, w2_ref, b2_ref, o_ref, acc_ref):
    # x_ref:  (tm, Hp)     token tile (resident across the reduction axis)
    # w1_ref: (tf, Hp)     W1 chunk
    # b1_ref: (1, tf)      f32
    # w2_ref: (Hp, tf)     W2 chunk
    # b2_ref: (1, Hp)      f32
    # acc_ref:(tm, Hp)     f32 accumulator scratch
    j = pl.program_id(1)  # reduction (4H-chunk) axis, last in grid

    @pl.when(j == 0)
    def _():
        acc_ref[...] = jnp.zeros_like(acc_ref)

    h = jax.lax.dot_general(
        x_ref[...], w1_ref[...],
        dimension_numbers=(((1,), (1,)), ((), ())),
        preferred_element_type=jnp.float32,
    )
    h = jnp.maximum(h + b1_ref[...], 0.0)
    # dropout == identity in eval mode.
    acc_ref[...] += jax.lax.dot_general(
        h.astype(w2_ref.dtype), w2_ref[...],
        dimension_numbers=(((1,), (1,)), ((), ())),
        preferred_element_type=jnp.float32,
    )

    @pl.when(j == pl.num_programs(1) - 1)
    def _():
        o_ref[...] = (acc_ref[...] + b2_ref[...]).astype(o_ref.dtype)


# ---------------------------------------------------------------------------
# Wrapper
# ---------------------------------------------------------------------------
def positionwise_feedforward(x, w1, b1, w2, b2, *, tm=None, tf=512,
                             weight_dtype=None, resident=None):
    """Fused FFN: linear1 -> ReLU -> (eval-mode dropout) -> linear2.

    x:  [B, S, H]
    w1: [4H, H]   (torch nn.Linear layout: [out, in])
    b1: [4H]
    w2: [H, 4H]
    b2: [H]
    weight_dtype: optionally cast weights AND x (e.g. jnp.bfloat16) so both matmuls
                  hit the MXU low-precision fast path; accumulation stays f32.
    resident: None = auto, True/False = force resident-weights / chunked path.
    """
    B, S, H = x.shape
    F4 = w1.shape[0]
    M = B * S
    out_dtype = x.dtype

    if weight_dtype is not None:
        w1 = w1.astype(weight_dtype)
        w2 = w2.astype(weight_dtype)
        x = x.astype(weight_dtype)      # both matmul operands on the fast MXU path

    xb = jnp.dtype(x.dtype).itemsize
    wb = jnp.dtype(w1.dtype).itemsize
    ob = jnp.dtype(out_dtype).itemsize

    vmem_cap = _vmem_capacity_bytes()
    usable = max(48 * _MIB, vmem_cap - 16 * _MIB)
    small_vmem = vmem_cap <= 64 * _MIB          # v7x-like: 64 MiB VMEM, 2 TensorCores

    # --- lane padding targets ---
    Hp = _round_up(H, 128)
    F4p128 = _round_up(F4, 128)

    # --- token-row tile, per generation ---
    if tm is None:
        tm = 512 if small_vmem else 768
    tm_eff = _round_up(min(tm, _round_up(M, 8)), 8)
    if small_vmem and M >= 16:
        # guarantee >=2 tiles on the parallel axis so both TensorCores are used
        tm_eff = min(tm_eff, _round_up(-(-M // 2), 8))

    # --- VMEM footprint models (double-buffered blocks + intermediates) ---
    h_extra = 4 + (wb if wb != 4 else 0)        # f32 h + low-precision cast copy

    def resident_footprint(tm_):
        weights = (F4p128 * Hp + Hp * F4p128) * wb + (F4p128 + Hp) * 4
        return (2 * tm_ * Hp * xb + 2 * tm_ * Hp * ob
                + 2 * weights
                + tm_ * F4p128 * h_extra)

    def chunked_footprint(tm_, tf_):
        return (2 * tm_ * Hp * xb + 2 * tm_ * Hp * ob
                + 2 * tf_ * Hp * wb + 2 * tf_ * 4
                + 2 * Hp * tf_ * wb + 2 * Hp * 4
                + tm_ * Hp * 4
                + tm_ * tf_ * h_extra)

    # --- resident-weights fast path decision ---
    resident_bytes = (F4p128 * Hp + Hp * F4p128) * wb + (F4p128 + Hp) * 4
    resident_budget = usable // 3
    use_resident = resident_bytes <= resident_budget if resident is None else bool(resident)

    tf_eff = None
    if use_resident:
        while tm_eff > 8 and resident_footprint(tm_eff) > usable:
            tm_eff = max(8, _round_up(tm_eff // 2, 8))
        if resident_footprint(tm_eff) > usable:
            use_resident = False

    if not use_resident:
        if F4 <= tf:
            tf_eff = F4p128
        else:
            tf_eff = max(128, (tf // 128) * 128)
            tf_eff = min(tf_eff, F4p128)
        while chunked_footprint(tm_eff, tf_eff) > usable and tm_eff > 256:
            tm_eff = max(256, _round_up(tm_eff // 2, 8))
        while chunked_footprint(tm_eff, tf_eff) > usable and tf_eff > 128:
            tf_eff = max(128, ((tf_eff // 2) // 128) * 128)

    F4p = F4p128 if use_resident else _round_up(F4, tf_eff)
    Mp = _round_up(M, tm_eff)

    # --- padding: extra rows are zero; extra H / 4H columns are zero weights / biases,
    #     so padded positions contribute exactly 0 and padded output columns are sliced ---
    x2d = x.reshape(M, H)
    if Hp != H:
        x2d = jnp.pad(x2d, ((0, 0), (0, Hp - H)))
        w1 = jnp.pad(w1, ((0, 0), (0, Hp - H)))
        w2 = jnp.pad(w2, ((0, Hp - H), (0, 0)))
        b2 = jnp.pad(b2, ((0, Hp - H),))
    if Mp != M:
        x2d = jnp.pad(x2d, ((0, Mp - M), (0, 0)))
    if F4p != F4:
        w1 = jnp.pad(w1, ((0, F4p - F4), (0, 0)))
        b1 = jnp.pad(b1, ((0, F4p - F4),))
        w2 = jnp.pad(w2, ((0, 0), (0, F4p - F4)))

    b1_2d = b1.reshape(1, F4p).astype(jnp.float32)
    b2_2d = b2.reshape(1, Hp).astype(jnp.float32)

    footprint = resident_footprint(tm_eff) if use_resident else chunked_footprint(tm_eff, tf_eff)
    vmem_limit = int(min(usable, max(32 * _MIB, int(1.25 * footprint))))

    if use_resident:
        grid = (Mp // tm_eff,)
        out2d = pl.pallas_call(
            _ffn_kernel_resident,
            out_shape=jax.ShapeDtypeStruct((Mp, Hp), out_dtype),
            grid_spec=pltpu.PrefetchScalarGridSpec(
                num_scalar_prefetch=0,
                grid=grid,
                in_specs=[
                    pl.BlockSpec((tm_eff, Hp), lambda i: (i, 0)),    # x tile
                    pl.BlockSpec((F4p, Hp), lambda i: (0, 0)),       # full W1 (resident)
                    pl.BlockSpec((1, F4p), lambda i: (0, 0)),        # b1
                    pl.BlockSpec((Hp, F4p), lambda i: (0, 0)),       # full W2 (resident)
                    pl.BlockSpec((1, Hp), lambda i: (0, 0)),         # b2
                ],
                out_specs=pl.BlockSpec((tm_eff, Hp), lambda i: (i, 0)),
            ),
            compiler_params=pltpu.CompilerParams(
                dimension_semantics=("parallel",),
                vmem_limit_bytes=vmem_limit,
            ),
        )(x2d, w1, b1_2d, w2, b2_2d)
    else:
        grid = (Mp // tm_eff, F4p // tf_eff)
        out2d = pl.pallas_call(
            _ffn_kernel_chunked,
            out_shape=jax.ShapeDtypeStruct((Mp, Hp), out_dtype),
            grid_spec=pltpu.PrefetchScalarGridSpec(
                num_scalar_prefetch=0,
                grid=grid,
                in_specs=[
                    pl.BlockSpec((tm_eff, Hp), lambda i, j: (i, 0)),   # x tile (reduction-invariant)
                    pl.BlockSpec((tf_eff, Hp), lambda i, j: (j, 0)),   # W1 chunk
                    pl.BlockSpec((1, tf_eff), lambda i, j: (0, j)),    # b1 chunk
                    pl.BlockSpec((Hp, tf_eff), lambda i, j: (0, j)),   # W2 chunk
                    pl.BlockSpec((1, Hp), lambda i, j: (0, 0)),        # b2
                ],
                out_specs=pl.BlockSpec((tm_eff, Hp), lambda i, j: (i, 0)),  # resident over reduction
                scratch_shapes=[pltpu.VMEM((tm_eff, Hp), jnp.float32)],
            ),
            compiler_params=pltpu.CompilerParams(
                dimension_semantics=("parallel", "arbitrary"),
                vmem_limit_bytes=vmem_limit,
            ),
        )(x2d, w1, b1_2d, w2, b2_2d)

    out2d = out2d[:M, :H]
    return out2d.reshape(B, S, H)


def _ref_ffn(x, w1, b1, w2, b2):
    return jnp.maximum(x @ w1.T + b1, 0.0) @ w2.T + b2


if __name__ == "__main__":
    key = jax.random.PRNGKey(0)

    # Test 1: small shape consistent with the module (batch=2, seq=8, hidden=32).
    # Exercises the resident-weights path + H lane-padding (32 -> 128).
    B, S, H = 2, 8, 32
    F4 = 4 * H
    kx, kw1, kb1, kw2, kb2, k2 = jax.random.split(key, 6)
    x = jax.random.normal(kx, (B, S, H), dtype=jnp.float32)
    w1 = jax.random.normal(kw1, (F4, H), dtype=jnp.float32) * (1.0 / jnp.sqrt(H))
    b1 = jax.random.normal(kb1, (F4,), dtype=jnp.float32) * 0.01
    w2 = jax.random.normal(kw2, (H, F4), dtype=jnp.float32) * (1.0 / jnp.sqrt(F4))
    b2 = jax.random.normal(kb2, (H,), dtype=jnp.float32) * 0.01

    out = positionwise_feedforward(x, w1, b1, w2, b2)
    jax.block_until_ready(out)
    ref = _ref_ffn(x, w1, b1, w2, b2)
    assert out.shape == (B, S, H)
    assert jnp.allclose(out, ref, atol=1e-4, rtol=1e-4)

    # Test 2: row padding (M not a multiple of the tile) + forced chunked 4H reduction
    # axis (tf=128 -> 2 chunks, accumulator init/finalize via pl.when).
    B2, S2, H2 = 2, 5, 64
    F42 = 4 * H2
    kx2, kw12, kb12, kw22, kb22 = jax.random.split(k2, 5)
    x2 = jax.random.normal(kx2, (B2, S2, H2), dtype=jnp.float32)
    w1_2 = jax.random.normal(kw12, (F42, H2), dtype=jnp.float32) * (1.0 / jnp.sqrt(H2))
    b1_2 = jax.random.normal(kb12, (F42,), dtype=jnp.float32) * 0.01
    w2_2 = jax.random.normal(kw22, (H2, F42), dtype=jnp.float32) * (1.0 / jnp.sqrt(F42))
    b2_2 = jax.random.normal(kb22, (H2,), dtype=jnp.float32) * 0.01

    out2 = positionwise_feedforward(x2, w1_2, b1_2, w2_2, b2_2,
                                    tm=256, tf=128, resident=False)
    jax.block_until_ready(out2)
    ref2 = _ref_ffn(x2, w1_2, b1_2, w2_2, b2_2)
    assert out2.shape == (B2, S2, H2)
    assert jnp.allclose(out2, ref2, atol=1e-4, rtol=1e-4)

    # Test 3: bf16 weight/activation storage (MXU fast path), f32 accumulation/output.
    out3 = positionwise_feedforward(x, w1, b1, w2, b2, weight_dtype=jnp.bfloat16)
    jax.block_until_ready(out3)
    assert out3.shape == (B, S, H)
    assert out3.dtype == x.dtype
    assert jnp.allclose(out3, ref, atol=1e-1, rtol=1e-1)

    print("KERNEL_OK")
</pallas_src>

<mosaic_0001>
module attributes {stable_mosaic.version = 11 : i64} {
  func.func @_ffn_kernel_resident(%arg0: i32, %arg1: memref<8x128xf32, #tpu.memory_space<vmem>>, %arg2: memref<128x128xf32, #tpu.memory_space<vmem>>, %arg3: memref<1x128xf32, #tpu.memory_space<vmem>>, %arg4: memref<128x128xf32, #tpu.memory_space<vmem>>, %arg5: memref<1x128xf32, #tpu.memory_space<vmem>>, %arg6: memref<8x128xf32, #tpu.memory_space<vmem>>) attributes {dimension_semantics = [#tpu.dimension_semantics<parallel>], iteration_bounds = array<i64: 2>, scalar_prefetch = 0 : i64, scratch_operands = 0 : i64, tpu.core_type = #tpu.core_type<tc>, window_params = [{transform_indices = @transform_0, window_bounds = array<i64: 8, 128>}, {pipeline_mode = #tpu.pipeline_mode<synchronous>, transform_indices = @transform_1, window_bounds = array<i64: 128, 128>}, {pipeline_mode = #tpu.pipeline_mode<synchronous>, transform_indices = @transform_2, window_bounds = array<i64: 1, 128>}, {pipeline_mode = #tpu.pipeline_mode<synchronous>, transform_indices = @transform_3, window_bounds = array<i64: 128, 128>}, {pipeline_mode = #tpu.pipeline_mode<synchronous>, transform_indices = @transform_4, window_bounds = array<i64: 1, 128>}, {transform_indices = @transform_5, window_bounds = array<i64: 8, 128>}]} {
    %c0 = arith.constant 0 : index
    %c0_0 = arith.constant 0 : index
    %0 = vector.load %arg1[%c0, %c0_0] : memref<8x128xf32, #tpu.memory_space<vmem>>, vector<8x128xf32>
    %c0_1 = arith.constant 0 : index
    %c0_2 = arith.constant 0 : index
    %1 = vector.load %arg2[%c0_1, %c0_2] : memref<128x128xf32, #tpu.memory_space<vmem>>, vector<128x128xf32>
    %cst = arith.constant dense<0.000000e+00> : vector<8x128xf32>
    %2 = tpu.matmul %0, %1, %cst {dimension_numbers = #tpu.dot_dimension_numbers<[1], [1], [0], [0], [0, 0, 1, 0], [], []>} : vector<8x128xf32>, vector<128x128xf32>, vector<8x128xf32> -> vector<8x128xf32>
    %c0_3 = arith.constant 0 : index
    %c0_4 = arith.constant 0 : index
    %3 = vector.load %arg3[%c0_3, %c0_4] : memref<1x128xf32, #tpu.memory_space<vmem>>, vector<1x128xf32>
    %4 = vector.broadcast %3 : vector<1x128xf32> to vector<8x128xf32>
    %5 = arith.addf %2, %4 : vector<8x128xf32>
    %cst_5 = arith.constant 0.000000e+00 : f32
    %6 = vector.broadcast %cst_5 : f32 to vector<8x128xf32>
    %7 = arith.maximumf %5, %6 : vector<8x128xf32>
    %c0_6 = arith.constant 0 : index
    %c0_7 = arith.constant 0 : index
    %8 = vector.load %arg4[%c0_6, %c0_7] : memref<128x128xf32, #tpu.memory_space<vmem>>, vector<128x128xf32>
    %cst_8 = arith.constant dense<0.000000e+00> : vector<8x128xf32>
    %9 = tpu.matmul %7, %8, %cst_8 {dimension_numbers = #tpu.dot_dimension_numbers<[1], [1], [0], [0], [0, 0, 1, 0], [], []>} : vector<8x128xf32>, vector<128x128xf32>, vector<8x128xf32> -> vector<8x128xf32>
    %c0_9 = arith.constant 0 : index
    %c0_10 = arith.constant 0 : index
    %10 = vector.load %arg5[%c0_9, %c0_10] : memref<1x128xf32, #tpu.memory_space<vmem>>, vector<1x128xf32>
    %11 = vector.broadcast %10 : vector<1x128xf32> to vector<8x128xf32>
    %12 = arith.addf %9, %11 : vector<8x128xf32>
    %c0_11 = arith.constant 0 : index
    %c0_12 = arith.constant 0 : index
    %13 = vector.load %arg6[%c0_11, %c0_12] : memref<8x128xf32, #tpu.memory_space<vmem>>, vector<8x128xf32>
    tpu.vector_store %arg6[%c0_11, %c0_12], %12 {strides = array<i32>} : memref<8x128xf32, #tpu.memory_space<vmem>>, vector<8x128xf32>,
    return
  }
  func.func @transform_0(%arg0: i32) -> (i32, i32) {
    %c0_i32 = arith.constant 0 : i32
    %c0_i32_0 = arith.constant 0 : i32
    return %arg0, %c0_i32 : i32, i32
  }
  func.func @transform_1(%arg0: i32) -> (i32, i32) {
    %c0_i32 = arith.constant 0 : i32
    %c0_i32_0 = arith.constant 0 : i32
    %c0_i32_1 = arith.constant 0 : i32
    return %c0_i32, %c0_i32_0 : i32, i32
  }
  func.func @transform_2(%arg0: i32) -> (i32, i32) {
    %c0_i32 = arith.constant 0 : i32
    %c0_i32_0 = arith.constant 0 : i32
    %c0_i32_1 = arith.constant 0 : i32
    return %c0_i32, %c0_i32_0 : i32, i32
  }
  func.func @transform_3(%arg0: i32) -> (i32, i32) {
    %c0_i32 = arith.constant 0 : i32
    %c0_i32_0 = arith.constant 0 : i32
    %c0_i32_1 = arith.constant 0 : i32
    return %c0_i32, %c0_i32_0 : i32, i32
  }
  func.func @transform_4(%arg0: i32) -> (i32, i32) {
    %c0_i32 = arith.constant 0 : i32
    %c0_i32_0 = arith.constant 0 : i32
    %c0_i32_1 = arith.constant 0 : i32
    return %c0_i32, %c0_i32_0 : i32, i32
  }
  func.func @transform_5(%arg0: i32) -> (i32, i32) {
    %c0_i32 = arith.constant 0 : i32
    %c0_i32_0 = arith.constant 0 : i32
    return %arg0, %c0_i32 : i32, i32
  }
}

</mosaic_0001>

<bundles_post_ra>
// kernel: tpu_custom_call.1
= control target key start
LH: loop header
LB: loop body
LE: loop exit
PB: predicated region body
PF: predicated region fallthrough
CT: control target
= control target key end

     0   :  { %10 = vsyncpa [#allocation3], 0  ;;  %s1258_s0 = inlined_call_operand.hbm [shape: f32[16,128], index: 0, kind: input, shape index: {}]   ;;  %s1259_s1 = inlined_call_operand.hbm [shape: f32[128,128], index: 1, kind: input, shape index: {}]   ;;  %s1260_s2 = inlined_call_operand.vmem [shape: f32[1,128], index: 2, kind: input, shape index: {}]   ;;  %s1261_s3 = inlined_call_operand.hbm [shape: f32[128,128], index: 3, kind: input, shape index: {}]   ;;  %s1262_s4 = inlined_call_operand.vmem [shape: f32[1,128], index: 4, kind: input, shape index: {}]   ;;  %s1263_s5 = inlined_call_operand.hbm [shape: f32[16,128], index: 5, kind: output, shape index: {}]  }
   0x1   :  { %12 = vsyncpa [#allocation3 + $0x1], 0 }
   0x2   :  { %13 = vsyncpa [#allocation6], 0 }
   0x3   :  { %14 = vsyncpa [#allocation4], 0 }
   0x4   :  { %16 = vsyncpa [#allocation4 + $0x1], 0  ;;  %s1000_s18 = smov 0   ;;  %s1002_s19 = smov 0  }
   0x5   :  { %s1004_s20 = smov 0   ;;  %s1006_s21 = smov 0  }
   0x6 LB: > { %s1021_s22 = sadd.s32 4294967295, %s959_s21   ;;  %s561_s23 = sadd.s32 4294967294, %s959_s21   ;;  %s959_s21 = sphi %s1006_s21, %s1283_s21   ;;  %s955_s20 = sphi %s1004_s20, %s1282_s20   ;;  %s951_s19 = sphi %s1002_s19, %s1281_s19   ;;  %s947_s18 = sphi %s1000_s18, %s1280_s18  }
   0x7   : > { %p42_p0 = scmp.ne.s32.totalorder %s951_s19, %s947_s18  ;;  %p1264_p1 = scmp.eq.s32.totalorder %s1021_s22, 0 }
   0x8   : > { %p156_p3 = scmp.eq.s32.totalorder %s561_s23, 1  ;;  %p562_p5 = scmp.ge.s32.totalorder %s959_s21, 1 }
   0x9   : > { %p1030_p4 = por %p1264_p1, %p42_p0  ;;  %p163_p7 = scmp.lt.s32.totalorder %s959_s21, 3 }
   0xa   : > { %p1035_p6 = por %p156_p3, %p42_p0  ;;  %s961_s27 = smov [#allocation5]  }
   0xb   : > { %s1267_s24 = scalar_select %p1030_p4, 1, 0 }
   0xc   : > { %s1268_s25 = scalar_select %p1035_p6, 1, 0 }
   0xd   : > { %p1040_p8 = pnand %p562_p5, %p163_p7  ;;  %s175_s28 = sshll.u32 %s961_s27, 4  ;;  %s1044_s28 = int_to_ptr.vmem [resolvable:$true] %s175_s28 }
   0xe   : > { %s962_s30 = smov [#allocation7]   ;;  %s803_s9 = scalar_lea.hbm %s1259_s1, 2048 }
   0xf   : > { %p743_p9 = pneg %p1040_p8  ;;  %s191_s6 = sshll.u32 %s962_s30, 4  ;;  %s1055_s6 = int_to_ptr.vmem [resolvable:$true] %s191_s6 }
  0x10   : > { %p804_p12 = scmp.ne.s32.totalorder %s1259_s1, %s803_s9  ;;  %p810_p5 = scmp.lt.u32.totalorder %s803_s9, %s1259_s1 }
  0x11   : > { %p1051_p11 = pnand %p743_p9, %p1264_p1 }
  0x13   : > { %p805_p13 = pneg %p1051_p11 }
  0x15   : > { %p806_p0 = pnand %p805_p13, %p804_p12 }
  0x17   : > { %p807_p3 = pneg %p806_p0 }
  0x19   : > { %p812_p7 = pnand %p810_p5, %p807_p3 }
  0x1b   : > { %815 = shalt.err (!%p812_p7)
}
  0x1c   : > { %s816_s14 = scalar_lea.vmem %s1044_s28, 2048  ;;  %p824_p2 = scmp.lt.s32.totalorder %s1044_s28, %s1044_s28 }
  0x1d   : > { %p817_p9 = scmp.ne.s32.totalorder %s1044_s28, %s816_s14  ;;  %p825_p12 = scmp.lt.s32.totalorder %s816_s14, %s816_s14 }
  0x1f   : > { %p819_p10 = pnand %p817_p9, %p805_p13  ;;  %p826_p0 = por %p825_p12, %p824_p2 }
  0x21   : > { %p820_p1 = pneg %p819_p10 }
  0x23   : > { %p827_p6 = pnand %p826_p0, %p820_p1 }
  0x25   : > { %830 = shalt.err (!%p827_p6)
}
  0x26   : > { %s963_s15 = smov 128   ;;  %s964_s16 = smov 8  }
  0x27   : > { %746 = dma.hbm_to_vmem [thread:$0]  (!%p1051_p11), %s1259_s1, 2048, %s1044_s28, [#allocation6], %s963_s15, %s963_s15, %s964_s16  }
  0x28   : > { %s831_s7 = scalar_lea.hbm %s1261_s3, 2048 }
  0x29   : > { %p832_p2 = scmp.ne.s32.totalorder %s1261_s3, %s831_s7  ;;  %p838_p10 = scmp.lt.u32.totalorder %s831_s7, %s1261_s3 }
  0x2b   : > { %p834_p1 = pnand %p832_p2, %p805_p13 }
  0x2d   : > { %p835_p6 = pneg %p834_p1 }
  0x2f   : > { %p840_p3 = pnand %p838_p10, %p835_p6 }
  0x31   : > { %843 = shalt.err (!%p840_p3)
}
  0x32   : > { %s844_s28 = scalar_lea.vmem %s1055_s6, 2048  ;;  %p852_p12 = scmp.lt.s32.totalorder %s1055_s6, %s1055_s6 }
  0x33   : > { %p845_p5 = scmp.ne.s32.totalorder %s1055_s6, %s844_s28  ;;  %p853_p0 = scmp.lt.s32.totalorder %s844_s28, %s844_s28 }
  0x35   : > { %p847_p7 = pnand %p845_p5, %p805_p13  ;;  %p854_p2 = por %p853_p0, %p852_p12 }
  0x37   : > { %p848_p9 = pneg %p847_p7 }
  0x39   : > { %p855_p1 = pnand %p854_p2, %p848_p9 }
  0x3b   : > { %858 = shalt.err (!%p855_p1)
}
  0x3c   : > { %749 = dma.hbm_to_vmem [thread:$0]  (!%p1051_p11), %s1261_s3, 2048, %s1055_s6, [#allocation6], %s963_s15, %s963_s15, %s964_s16  }
  0x3d   : > { %s1110_s14 = sadd.s32 1, %s959_s21   ;;  %s29_s29 = sadd.s32 1, %s955_s20 }
  0x3e   : > { %s26_s17 = ssub.s32 %s959_s21, %s1110_s14  ;;  %p36_p13 = scmp.ne.s32.totalorder %s955_s20, %s951_s19 }
  0x3f   : > { %p27_p6 = scmp.eq.s32.totalorder %s26_s17, 0  ;;  %p37_p10 = scmp.eq.s32.totalorder %s959_s21, 0 }
  0x40   : > { %p1271_p3 = scmp.eq.s32.totalorder %s1021_s22, 1  ;;  %p760_p7 = scmp.lt.s32.totalorder %s959_s21, 2 }
  0x41   : > { %s1126_s27 = scalar_select %p27_p6, %s955_s20, %s29_s29  }
  0x42   : > { %p1120_p5 = por %p1271_p3, %p36_p13  ;;  %p38_p9 = por %p37_p10, %p36_p13 }
  0x43   : > { %s208_s30 = sand.u32 1, %s955_s20   ;;  %s567_s6 = sshll.u32 %s959_s21, 7 }
  0x44   : > { %s1272_s23 = scalar_select %p1120_p5, 1, 0 }
  0x45   : > { %s566_s7 = sshll.u32 %s208_s30, 3  ;;  %s1133_s8 = scalar_lea.hbm %s1258_s0, %s567_s6 }
  0x46   : > { %s212_s9 = scalar_lea.vmem [#allocation2], %s566_s7  ;;  %p1137_p11 = pnand %p760_p7, %p38_p9 }
  0x47   : > { %s219_s10 = sshll.u32 %s212_s9, 4  ;;  %s209_s28 = scalar_lea.sflag [#allocation3], %s208_s30  ;;  %s1135_s10 = int_to_ptr.vmem [resolvable:$true] %s219_s10 }
  0x48   : > { %s859_s12 = scalar_lea.hbm %s1133_s8, 128  ;;  %p861_p0 = pneg %p1137_p11 }
  0x49   : > { %p860_p12 = scmp.ne.s32.totalorder %s1133_s8, %s859_s12  ;;  %s864_s17 = scalar_lea.hbm %s1258_s0, 256 }
  0x4a   : > { %p865_p13 = scmp.lt.u32.totalorder %s1133_s8, %s1258_s0  ;;  %p866_p6 = scmp.lt.u32.totalorder %s864_s17, %s859_s12 }
  0x4b   : > { %p862_p2 = pnand %p861_p0, %p860_p12  ;;  %p868_p3 = scmp.lt.u32.totalorder %s859_s12, %s1133_s8 }
  0x4c   : > { %p867_p10 = por %p866_p6, %p865_p13 }
  0x4d   : > { %p863_p1 = pneg %p862_p2 }
  0x4e   : > { %p869_p7 = por %p868_p3, %p867_p10 }
  0x50   : > { %p870_p9 = pnand %p869_p7, %p863_p1 }
  0x52   : > { %873 = shalt.err (!%p870_p9)
}
  0x53   : > { %s874_s30 = scalar_lea.vmem %s1135_s10, 128  ;;  %s965_s15 = smov [#allocation2]  }
  0x54   : > { %p875_p12 = scmp.ne.s32.totalorder %s1135_s10, %s874_s30  ;;  %s879_s16 = sshll.u32 %s965_s15, 4  ;;  %s880_s16 = int_to_ptr.vmem [resolvable:$false] %s879_s16 }
  0x55   : > { %s881_s9 = scalar_lea.vmem %s880_s16, 256  ;;  %p882_p4 = scmp.lt.s32.totalorder %s1135_s10, %s880_s16 }
  0x56   : > { %p877_p2 = pnand %p875_p12, %p861_p0  ;;  %p883_p13 = scmp.lt.s32.totalorder %s881_s9, %s874_s30 }
  0x58   : > { %p878_p5 = pneg %p877_p2  ;;  %p884_p6 = por %p883_p13, %p882_p4 }
  0x5a   : > { %p885_p10 = pnand %p884_p6, %p878_p5 }
  0x5c   : > { %888 = shalt.err (!%p885_p10)
}
  0x5d   : > { %753 = dma.hbm_to_vmem [thread:$0]  (!%p1137_p11), %s1133_s8, 128, %s1135_s10, %s209_s28  }
  0x5e   : > { %228 = sbr.rel (%p1040_p8) target bundleno = 615 (0x267), region = 40  ;;  %s1169_s12 = sand.u32 (!%p1040_p8), 1, %s951_s19  }
  0x5f   : > { %s569_s13 = sshll.u32 (!%p1040_p8), %s1169_s12, 3  ;;  %s231_s29 = scalar_lea.sflag (!%p1040_p8), [#allocation3], %s1169_s12 }
  0x60   : > { %s1175_s17 = scalar_lea.vmem (!%p1040_p8), [#allocation2], %s569_s13  ;;  %p1274_p4 = scmp.ne.s32.totalorder (!%p1040_p8), %s1267_s24, 0 }
  0x65   : > { %934 = dma.done.wait (%p1274_p4), %s231_s29, 128  }
  0x66   : > { %936 = vsyncadd (%p1274_p4), %s231_s29, 4294967168  ;;  %p1275_p5 = scmp.eq.s32.totalorder %s1021_s22, 0 }
  0x68   : > { %938 = dma.done.wait (%p1275_p5), [#allocation6], 4096   ;;  %p1276_p8 = pmov %p1275_p5 }
  0x69   : > { %v966_v0 = vmov 0.0|0.0   ;;  %vm967_vm0 = vmmov 0   ;;  %v968_v1 = vmov 0.0   ;;  %v270_v2 = vld [vmem:[#allocation5] sm:$0xff]  ;;  %v271_v3 = vld [vmem:[#allocation5 + $0x8] sm:$0xff]  ;;  %v272_v5 = vld [vmem:[#allocation5 + $0x10] sm:$0xff] }
  0x6a   : > { %940 = vsyncadd (%p1276_p8), [#allocation6], 4294963200  ;;  %683 = vmatprep.subr.bf16.mxu0 %v966_v0  ;;  %645 = vmatprep.mubr.msk.f32.mxu0 %vm967_vm0, %v968_v1  ;;  %v684_v4 = vpack.c.bf16 %v271_v3, %v270_v2  ;;  %v273_v6 = vld [vmem:[#allocation5 + $0x18] sm:$0xff]  ;;  %v364_v7 = vld [vmem:[#allocation7] sm:$0xff]  ;;  %s576_s11 = sshll.u32 %s1021_s22, 7  ;;  %s268_s28 = scalar_lea.vmem [#allocation8], %s569_s13 }
  0x6b   : > { %707 = vmatprep.subr.bf16.mxu1 %v966_v0  ;;  %680 = vmatprep.mubr.msk.f32.mxu1 %vm967_vm0, %v968_v1  ;;  %v365_v8 = vld [vmem:[#allocation7 + $0x8] sm:$0xff]  ;;  %v687_v9 = vpack.c.bf16 %v273_v6, %v272_v5  ;;  %v366_v11 = vld [vmem:[#allocation7 + $0x10] sm:$0xff]  ;;  %v367_v12 = vld [vmem:[#allocation7 + $0x18] sm:$0xff]  ;;  %s472_s7 = sshll.u32 %s268_s28, 4  ;;  %s1214_s15 = scalar_lea.hbm %s1263_s5, %s576_s11  ;;  %s1216_s7 = int_to_ptr.vmem [resolvable:$true] %s472_s7 }
  0x6c   : > { %685 = vmatpush3.bf16.xpose.msra.mxu0 %v684_v4  ;;  %v708_v10 = vpack.c.bf16 %v365_v8, %v364_v7  ;;  %v274_v13 = vld [vmem:[#allocation5 + $0x20] sm:$0xff]  ;;  %v275_v14 = vld [vmem:[#allocation5 + $0x28] sm:$0xff]  ;;  %v711_v15 = vpack.c.bf16 %v367_v12, %v366_v11  ;;  %v276_v19 = vld [vmem:[#allocation5 + $0x30] sm:$0xff]  ;;  %s459_s16 = scalar_lea.sflag [#allocation4], %s1169_s12  ;;  %s889_s9 = scalar_lea.vmem %s1216_s7, 128 }
  0x6d   : > { %686 = vmatprep.subr.bf16.mxu0 %v966_v0  ;;  %v690_v16 = vpack.c.bf16 %v275_v14, %v274_v13  ;;  %v368_v17 = vld [vmem:[#allocation7 + $0x20] sm:$0xff]  ;;  %v369_v18 = vld [vmem:[#allocation7 + $0x28] sm:$0xff]  ;;  %v277_v20 = vld [vmem:[#allocation5 + $0x38] sm:$0xff]  ;;  %p890_p11 = scmp.ne.s32.totalorder %s1216_s7, %s889_s9  ;;  %p1277_p0 = scmp.ne.s32.totalorder %s1272_s23, 0 }
  0x6e   : > { %709 = vmatpush3.bf16.xpose.msra.mxu1 %v708_v10  ;;  %v714_v21 = vpack.c.bf16 %v369_v18, %v368_v17  ;;  %v693_v22 = vpack.c.bf16 %v277_v20, %v276_v19  ;;  %v370_v23 = vld [vmem:[#allocation7 + $0x30] sm:$0xff]  ;;  %v371_v24 = vld [vmem:[#allocation7 + $0x38] sm:$0xff]  ;;  %v278_v25 = vld [vmem:[#allocation5 + $0x40] sm:$0xff]  ;;  %s969_s22 = smov [#allocation8]  }
  0x6f   : > { %710 = vmatprep.subr.bf16.mxu1 %v966_v0  ;;  %v279_v26 = vld [vmem:[#allocation5 + $0x48] sm:$0xff]  ;;  %v717_v27 = vpack.c.bf16 %v371_v24, %v370_v23  ;;  %v372_v29 = vld [vmem:[#allocation7 + $0x40] sm:$0xff]  ;;  %v280_v31 = vld [vmem:[#allocation5 + $0x50] sm:$0xff]  ;;  %p891_p1 = pnand %p890_p11, %p1277_p0  ;;  %s893_s13 = sshll.u32 %s969_s22, 4  ;;  %s894_s13 = int_to_ptr.vmem [resolvable:$false] %s893_s13 }
  0x70   : > { %v696_v28 = vpack.c.bf16 %v279_v26, %v278_v25  ;;  %v373_v30 = vld [vmem:[#allocation7 + $0x48] sm:$0xff]  ;;  %v281_v32 = vld [vmem:[#allocation5 + $0x58] sm:$0xff]  ;;  %v374_v35 = vld [vmem:[#allocation7 + $0x50] sm:$0xff]  ;;  %s895_s29 = scalar_lea.vmem %s894_s13, 256  ;;  %p896_p7 = scmp.lt.s32.totalorder %s1216_s7, %s894_s13 }
  0x71   : > { %v720_v33 = vpack.c.bf16 %v373_v30, %v372_v29  ;;  %v699_v34 = vpack.c.bf16 %v281_v32, %v280_v31  ;;  %v375_v36 = vld [vmem:[#allocation7 + $0x58] sm:$0xff]  ;;  %v282_v37 = vld [vmem:[#allocation5 + $0x60] sm:$0xff]  ;;  %v283_v38 = vld [vmem:[#allocation5 + $0x68] sm:$0xff]  ;;  %p892_p3 = pneg %p891_p1  ;;  %p897_p9 = scmp.lt.s32.totalorder %s895_s29, %s889_s9 }
  0x72   : > { %v723_v39 = vpack.c.bf16 %v375_v36, %v374_v35  ;;  %v702_v40 = vpack.c.bf16 %v283_v38, %v282_v37  ;;  %v376_v41 = vld [vmem:[#allocation7 + $0x60] sm:$0xff]  ;;  %v377_v42 = vld [vmem:[#allocation7 + $0x68] sm:$0xff]  ;;  %v284_v43 = vld [vmem:[#allocation5 + $0x70] sm:$0xff] }
  0x73   : > { %v285_v44 = vld [vmem:[#allocation5 + $0x78] sm:$0xff]  ;;  %v726_v45 = vpack.c.bf16 %v377_v42, %v376_v41  ;;  %v378_v47 = vld [vmem:[#allocation7 + $0x70] sm:$0xff]  ;;  %p898_p12 = por %p897_p9, %p896_p7 }
  0x74   : > { %688 = vmatpush3.bf16.xpose.msra.mxu0 %v687_v9  ;;  %v705_v46 = vpack.c.bf16 %v285_v44, %v284_v43  ;;  %v379_v48 = vld [vmem:[#allocation7 + $0x78] sm:$0xff]  ;;  %v573_v51 = vld [vmem:[%s1260_s2] ss:$0 sm:$0xff] }
  0x75   : > { %689 = vmatprep.subr.bf16.mxu0 %v966_v0  ;;  %v729_v49 = vpack.c.bf16 %v379_v48, %v378_v47  ;;  %v269_v50 = vld [vmem:[%s1175_s17] sm:$0xff]  ;;  %p899_p2 = pnand %p898_p12, %p892_p3 }
  0x76   : > { %712 = vmatpush3.bf16.xpose.msra.mxu1 %v711_v15  ;;  %v574_v56 = vld [vmem:[%s1262_s4] ss:$0 sm:$0xff] }
  0x77   : > { %713 = vmatprep.subr.bf16.mxu1 %v966_v0 }
  0x7c   : > { %691 = vmatpush3.bf16.xpose.msra.mxu0 %v690_v16 }
  0x7d   : > { %692 = vmatprep.subr.bf16.mxu0 %v966_v0 }
  0x7e   : > { %715 = vmatpush3.bf16.xpose.msra.mxu1 %v714_v21 }
  0x7f   : > { %716 = vmatprep.subr.bf16.mxu1 %v966_v0 }
  0x84   : > { %694 = vmatpush3.bf16.xpose.msra.mxu0 %v693_v22 }
  0x85   : > { %695 = vmatprep.subr.bf16.mxu0 %v966_v0 }
  0x86   : > { %718 = vmatpush3.bf16.xpose.msra.mxu1 %v717_v27 }
  0x87   : > { %719 = vmatprep.subr.bf16.mxu1 %v966_v0 }
  0x8c   : > { %697 = vmatpush3.bf16.xpose.msra.mxu0 %v696_v28 }
  0x8d   : > { %698 = vmatprep.subr.bf16.mxu0 %v966_v0 }
  0x8e   : > { %721 = vmatpush3.bf16.xpose.msra.mxu1 %v720_v33 }
  0x8f   : > { %722 = vmatprep.subr.bf16.mxu1 %v966_v0 }
  0x94   : > { %700 = vmatpush3.bf16.xpose.msra.mxu0 %v699_v34 }
  0x95   : > { %701 = vmatprep.subr.bf16.mxu0 %v966_v0 }
  0x96   : > { %724 = vmatpush3.bf16.xpose.msra.mxu1 %v723_v39 }
  0x97   : > { %725 = vmatprep.subr.bf16.mxu1 %v966_v0 }
  0x9c   : > { %703 = vmatpush3.bf16.xpose.msra.mxu0 %v702_v40 }
  0x9d   : > { %704 = vmatprep.subr.bf16.mxu0 %v966_v0 }
  0x9e   : > { %727 = vmatpush3.bf16.xpose.msra.mxu1 %v726_v45 }
  0x9f   : > { %728 = vmatprep.subr.bf16.mxu1 %v966_v0 }
  0xa4   : > { %706 = vmatpush3.bf16.xpose.msra.mxu0 %v705_v46 }
  0xa6   : > { %730 = vmatpush3.bf16.xpose.msra.mxu1 %v729_v49 }
  0xab   : > { %646 = vmatmul.mubr.f32.vlgmr.msra.gmra.mrb[0].mxu0 %v269_v50 }
 0x17e   : > { %v359_v52 = vpop.f32.mrb[0].mxu0 }
 0x17f   : > { %v360_v53 = vadd.f32 %v573_v51, %v359_v52  ;;  %v647_v54 = vpop.f32.mrb[1].mxu0 }
 0x181   : > { %v363_v55 = vmax.f32 %v360_v53, 0.0 }
 0x183   : > { %681 = vmatmul.mubr.f32.vlgmr.msra.gmra.mrb[0].mxu1 %v363_v55 }
 0x256   : > { %v453_v57 = vpop.f32.mrb[0].mxu1 }
 0x257   : > { %v454_v58 = vadd.f32 %v574_v56, %v453_v57  ;;  %v682_v59 = vpop.f32.mrb[1].mxu1 }
 0x259   : > { %457 = vst [vmem:[%s268_s28] sm:$0xff] %v454_v58 }
 0x25a   : > { %902 = shalt.err (!%p899_p2)
}
 0x25b   : > { %s903_s12 = scalar_lea.hbm %s1214_s15, 128  ;;  %s907_s26 = scalar_lea.hbm %s1263_s5, 256 }
 0x25c   : > { %p904_p13 = scmp.ne.s32.totalorder %s1214_s15, %s903_s12  ;;  %p908_p4 = scmp.lt.u32.totalorder %s1214_s15, %s1263_s5 }
 0x25d   : > { %p909_p5 = scmp.lt.u32.totalorder %s907_s26, %s903_s12  ;;  %p911_p11 = scmp.lt.u32.totalorder %s903_s12, %s1214_s15 }
 0x25e   : > { %p905_p6 = pnand %p904_p13, %p1277_p0 }
 0x25f   : > { %p910_p8 = por %p909_p5, %p908_p4 }
 0x260   : > { %p906_p10 = pneg %p905_p6 }
 0x261   : > { %p912_p1 = por %p911_p11, %p910_p8 }
 0x263   : > { %p913_p3 = pnand %p912_p1, %p906_p10 }
 0x265   : > { %916 = shalt.err (!%p913_p3)
}
 0x266   : > { %741 = dma.vmem_to_hbm [thread:$0]  (%p1277_p0), %s1216_s7, 128, %s1214_s15, %s459_s16  }
 0x267 PF: > { %s484_s11 = sand.u32 1, %s947_s18   ;;  %p1278_p7 = scmp.ne.s32.totalorder %s1268_s25, 0 }
 0x268   : > { %p1279_p9 = scmp.ge.s32.totalorder %s959_s21, 2  ;;  %s485_s28 = scalar_lea.sflag [#allocation4], %s484_s11 }
 0x26a   : > { %p755_p12 = pnand %p1279_p9, %p1278_p7 }
 0x26c   : > { %942 = dma.done.wait (!%p755_p12), %s485_s28, 128  }
 0x26d   : > { %944 = vsyncadd (!%p755_p12), %s485_s28, 4294967168  ;;  %p19_p2 = scmp.ge.s32.totalorder %s1110_s14, 4   ;;  %s1280_s18 = smov %s951_s19 }
 0x26e   : > { %s1281_s19 = smov %s955_s20  ;;  %s1282_s20 = smov %s1126_s27 }
 0x26f   : > { %s1283_s21 = smov %s1110_s14  ;;  %21 = sbr.rel (!%p19_p2) target bundleno = 6 (0x6), region = 93 }
 0x276   :  { %490 = vsyncpa [#allocation3], 1 }
 0x277   :  { %492 = vsyncpa [#allocation3 + $0x1], 1 }
 0x278   :  { %493 = vsyncpa [#allocation6], 1 }
 0x279   :  { %494 = vsyncpa [#allocation4], 1 }
 0x27a   :  { %496 = vsyncpa [#allocation4 + $0x1], 1 }

</bundles_post_ra>
